<compile_context>
chip_gen: v5e
topology: v5e:2x2
jax: 0.10.0
libtpu: 0.0.40
codegen_flags: <defaults>
</compile_context>

<pallas_src>
import functools

import jax
import jax.numpy as jnp
from jax.experimental import pallas as pl
from jax.experimental.pallas import tpu as pltpu

_EPS = 1e-5


# ----------------------------------------------------------------------------
# Kernels
# ----------------------------------------------------------------------------
def _qin_fused_kernel(gamma_ref, beta_ref, x_ref, o_ref, *, eps, inv_hw):
    """Single-pass-stats + FMA-apply. Whole spatial extent resident.

    gamma_ref: (1, Tc, 1) f32   beta_ref: (4, Tc, 1) f32
    x_ref / o_ref: (4, Tc, HW) — lane axis is the flattened spatial dim.
    """
    x = x_ref[...].astype(jnp.float32)                       # (4, Tc, HW)
    s1 = jnp.sum(x, axis=-1, keepdims=True)                  # (4, Tc, 1)
    s2 = jnp.sum(x * x, axis=-1, keepdims=True)              # (4, Tc, 1)

    mu = s1 * inv_hw                                         # (4, Tc, 1)
    # quaternion variance per channel: sum over components of E[x^2] - mu^2
    quat_var = jnp.sum(s2 * inv_hw - mu * mu, axis=0, keepdims=True)  # (1,Tc,1)
    quat_var = jnp.maximum(quat_var, 0.0)

    scale = gamma_ref[...] * jax.lax.rsqrt(quat_var + eps)   # (1, Tc, 1)
    shift = beta_ref[...] - mu * scale                       # (4, Tc, 1)

    # Apply as one FMA over the tile; re-read x_ref so no full-tile f32 temp
    # has to stay live across the reduction (no extra VMEM round trip).
    o_ref[...] = (x_ref[...].astype(jnp.float32) * scale + shift).astype(o_ref.dtype)


def _stats_kernel(x_ref, s1_ref, s2_ref, *, hw, ts, mask_tail):
    """Running sum / sum-of-squares over a spatially tiled input."""
    s = pl.program_id(2)

    @pl.when(s == 0)
    def _():
        s1_ref[...] = jnp.zeros_like(s1_ref)
        s2_ref[...] = jnp.zeros_like(s2_ref)

    x = x_ref[...].astype(jnp.float32)                       # (4, Tc, Ts)
    if mask_tail:
        lane = jax.lax.broadcasted_iota(jnp.int32, x.shape, dimension=x.ndim - 1)
        x = jnp.where(s * ts + lane < hw, x, 0.0)
    s1_ref[...] += jnp.sum(x, axis=-1, keepdims=True)
    s2_ref[...] += jnp.sum(x * x, axis=-1, keepdims=True)


def _apply_kernel(gamma_ref, beta_ref, s1_ref, s2_ref, x_ref, o_ref, *, eps, inv_hw):
    """Normalize a spatial tile from precomputed per-channel sums."""
    mu = s1_ref[...] * inv_hw                                # (4, Tc, 1)
    quat_var = jnp.sum(s2_ref[...] * inv_hw - mu * mu, axis=0, keepdims=True)
    quat_var = jnp.maximum(quat_var, 0.0)
    scale = gamma_ref[...] * jax.lax.rsqrt(quat_var + eps)   # (1, Tc, 1)
    shift = beta_ref[...] - mu * scale                       # (4, Tc, 1)
    o_ref[...] = (x_ref[...].astype(jnp.float32) * scale + shift).astype(o_ref.dtype)


# ----------------------------------------------------------------------------
# Tiling helpers
# ----------------------------------------------------------------------------
def _tpu_vmem_capacity_bytes():
    try:
        return int(pltpu.get_tpu_info().vmem_capacity_bytes)
    except Exception:
        return 128 << 20          # assume 128 MiB (v5e/v6e-class) if unknown


def _pick_channel_tile(cq, hw, itemsize, budget, sub, *, min_blocks=1):
    """Largest sublane-aligned channel tile whose (4, Tc, HW) block fits budget."""
    per_ch = 4 * hw * itemsize
    tc = max(1, int(budget // per_ch))
    if min_blocks > 1:
        tc = min(tc, max(1, cq // min_blocks))   # force >= min_blocks channel blocks
    if tc >= cq:
        return cq
    if tc < sub:
        return min(sub, cq)
    tc = (tc // sub) * sub
    # Prefer a tile that divides Cq (avoids a padded trailing channel block).
    cand = tc
    for _ in range(64):
        if cand < sub:
            break
        if cq % cand == 0:
            return cand
        cand -= sub
    return tc


def _vmem_limit_bytes(tc, lanes, itemsize, ceiling):
    blk_in = 4 * tc * lanes * itemsize           # one (4, Tc, lanes) block, input dtype
    blk_f32 = 4 * tc * lanes * 4                 # f32 temporaries during the reduce
    need = 2 * 2 * blk_in + 2 * blk_f32 + (4 << 20)
    return int(min(ceiling, max(16 << 20, need)))


# ----------------------------------------------------------------------------
# Wrapper
# ----------------------------------------------------------------------------
def quaternion_instance_norm2d(x, gamma, beta, *, eps=_EPS,
                               block_budget_bytes=None, spatial_block=None):
    """x: (N, 4*Cq, H, W); gamma: (1, Cq, 1, 1); beta: (1, 4*Cq, 1, 1).

    spatial_block: optional spatial tile size (multiple of 128) forcing the
    spatially-tiled two-kernel path (used for very large H*W, and for tests).
    """
    N, C, H, W = x.shape
    assert C % 4 == 0, "channel count must be a multiple of 4"
    Cq = C // 4
    HW = H * W
    itemsize = jnp.dtype(x.dtype).itemsize
    sub = max(8, 32 // itemsize)                 # sublane packing: 8/f32, 16/bf16, 32/i8

    vmem_cap = _tpu_vmem_capacity_bytes()
    small_vmem = vmem_cap <= (64 << 20)          # v7x-class (2 TCs, 64 MiB VMEM)
    if block_budget_bytes is None:
        block_budget_bytes = (4 << 20) if small_vmem else (8 << 20)
    vmem_ceiling = (40 << 20) if small_vmem else (64 << 20)

    # Free, contiguous reshapes; HW becomes the lane axis (lane-dense I/O).
    x4 = x.reshape(N, 4, Cq, HW)
    gamma_v = gamma.reshape(1, Cq, 1).astype(jnp.float32)
    beta_v = beta.reshape(4, Cq, 1).astype(jnp.float32)
    inv_hw = 1.0 / HW

    min_tc = min(sub, Cq)
    needs_spatial = (spatial_block is not None) or (
        4 * min_tc * HW * itemsize > block_budget_bytes)

    if not needs_spatial:
        # ---------------- fused single-kernel path (whole H*W resident) ------
        min_blocks = 2 if (small_vmem and N == 1) else 1   # keep both v7x TCs busy
        Tc = _pick_channel_tile(Cq, HW, itemsize, block_budget_bytes, sub,
                                min_blocks=min_blocks)
        grid = (pl.cdiv(Cq, Tc), N)                        # batch innermost: gamma/beta
                                                           # block index stays constant
        out4 = pl.pallas_call(
            functools.partial(_qin_fused_kernel, eps=eps, inv_hw=inv_hw),
            out_shape=jax.ShapeDtypeStruct((N, 4, Cq, HW), x.dtype),
            grid=grid,
            in_specs=[
                pl.BlockSpec((1, Tc, 1), lambda c, b: (0, c, 0)),         # gamma
                pl.BlockSpec((4, Tc, 1), lambda c, b: (0, c, 0)),         # beta
                pl.BlockSpec((None, 4, Tc, HW), lambda c, b: (b, 0, c, 0)),
            ],
            out_specs=pl.BlockSpec((None, 4, Tc, HW), lambda c, b: (b, 0, c, 0)),
            compiler_params=pltpu.CompilerParams(
                dimension_semantics=("parallel", "parallel"),
                vmem_limit_bytes=_vmem_limit_bytes(Tc, HW, itemsize, vmem_ceiling)),
        )(gamma_v, beta_v, x4)
        return out4.reshape(N, C, H, W)

    # ---------------- spatially-tiled two-kernel path (large H*W) ------------
    Tc = min(sub, Cq)
    if spatial_block is not None:
        ts = int(spatial_block)
    else:
        ts = max(128, (int(block_budget_bytes) // (4 * Tc * itemsize) // 128) * 128)
    if ts >= HW:
        ts = HW                                    # full extent is always a legal block
    num_s = pl.cdiv(HW, ts)
    grid = (pl.cdiv(Cq, Tc), N, num_s)             # spatial (reduction) axis innermost
    mask_tail = (HW % ts) != 0
    vmem_limit = _vmem_limit_bytes(Tc, ts, itemsize, vmem_ceiling)

    stats_shape = jax.ShapeDtypeStruct((N, 4, Cq, 1), jnp.float32)
    s1, s2 = pl.pallas_call(
        functools.partial(_stats_kernel, hw=HW, ts=ts, mask_tail=mask_tail),
        out_shape=(stats_shape, stats_shape),
        grid=grid,
        in_specs=[pl.BlockSpec((None, 4, Tc, ts), lambda c, b, s: (b, 0, c, s))],
        out_specs=(pl.BlockSpec((None, 4, Tc, 1), lambda c, b, s: (b, 0, c, 0)),
                   pl.BlockSpec((None, 4, Tc, 1), lambda c, b, s: (b, 0, c, 0))),
        compiler_params=pltpu.CompilerParams(
            dimension_semantics=("parallel", "parallel", "arbitrary"),
            vmem_limit_bytes=vmem_limit),
    )(x4)

    out4 = pl.pallas_call(
        functools.partial(_apply_kernel, eps=eps, inv_hw=inv_hw),
        out_shape=jax.ShapeDtypeStruct((N, 4, Cq, HW), x.dtype),
        grid=grid,
        in_specs=[
            pl.BlockSpec((1, Tc, 1), lambda c, b, s: (0, c, 0)),          # gamma
            pl.BlockSpec((4, Tc, 1), lambda c, b, s: (0, c, 0)),          # beta
            pl.BlockSpec((None, 4, Tc, 1), lambda c, b, s: (b, 0, c, 0)), # sum(x)
            pl.BlockSpec((None, 4, Tc, 1), lambda c, b, s: (b, 0, c, 0)), # sum(x^2)
            pl.BlockSpec((None, 4, Tc, ts), lambda c, b, s: (b, 0, c, s)),
        ],
        out_specs=pl.BlockSpec((None, 4, Tc, ts), lambda c, b, s: (b, 0, c, s)),
        compiler_params=pltpu.CompilerParams(
            dimension_semantics=("parallel", "parallel", "arbitrary"),
            vmem_limit_bytes=vmem_limit),
    )(gamma_v, beta_v, s1, s2, x4)
    return out4.reshape(N, C, H, W)


# ----------------------------------------------------------------------------
# Pure-JAX reference (mirrors the PyTorch forward)
# ----------------------------------------------------------------------------
def _reference(x, gamma, beta, eps=_EPS):
    r, i, j, k = jnp.split(x, 4, axis=1)
    mu_r = jnp.mean(r, axis=(2, 3), keepdims=True)
    mu_i = jnp.mean(i, axis=(2, 3), keepdims=True)
    mu_j = jnp.mean(j, axis=(2, 3), keepdims=True)
    mu_k = jnp.mean(k, axis=(2, 3), keepdims=True)
    dr, di, dj, dk = r - mu_r, i - mu_i, j - mu_j, k - mu_k
    var = jnp.mean(dr ** 2 + di ** 2 + dj ** 2 + dk ** 2, axis=(2, 3), keepdims=True)
    denom = jnp.sqrt(var + eps)
    br, bi, bj, bk = jnp.split(beta, 4, axis=1)
    new_r = gamma * (dr / denom) + br
    new_i = gamma * (di / denom) + bi
    new_j = gamma * (dj / denom) + bj
    new_k = gamma * (dk / denom) + bk
    return jnp.concatenate([new_r, new_i, new_j, new_k], axis=1)


if __name__ == "__main__":
    key = jax.random.PRNGKey(0)
    N, C, H, W = 2, 8, 16, 16            # num_features = 8 -> Cq = 2
    Cq = C // 4

    x = jax.random.normal(key, (N, C, H, W), dtype=jnp.float32)
    # Module defaults are gamma=1, beta=0; perturb so both paths are exercised.
    gamma = 1.0 + 0.1 * jnp.arange(Cq, dtype=jnp.float32).reshape(1, Cq, 1, 1)
    beta = 0.05 * jnp.arange(4 * Cq, dtype=jnp.float32).reshape(1, 4 * Cq, 1, 1)

    ref = _reference(x, gamma, beta)

    # Fused single-kernel path (whole spatial extent resident).
    out = jax.block_until_ready(quaternion_instance_norm2d(x, gamma, beta))
    assert out.shape == (N, C, H, W)
    assert jnp.allclose(out, ref, atol=1e-4, rtol=1e-4), "fused path mismatch"

    # Spatially-tiled two-kernel path (the large-H*W structure), forced here on
    # small shapes so both code paths are compiled and verified.
    out_tiled = jax.block_until_ready(
        quaternion_instance_norm2d(x, gamma, beta, spatial_block=128))
    assert jnp.allclose(out_tiled, ref, atol=1e-4, rtol=1e-4), "tiled path mismatch"

    print("KERNEL_OK")
</pallas_src>

<mosaic_0001>
module attributes {stable_mosaic.version = 11 : i64} {
  func.func @_qin_fused_kernel(%arg0: i32, %arg1: i32, %arg2: memref<1x2x1xf32, #tpu.memory_space<vmem>>, %arg3: memref<4x2x1xf32, #tpu.memory_space<vmem>>, %arg4: memref<1x4x2x256xf32, #tpu.memory_space<vmem>>, %arg5: memref<1x4x2x256xf32, #tpu.memory_space<vmem>>) attributes {dimension_semantics = [#tpu.dimension_semantics<parallel>, #tpu.dimension_semantics<parallel>], iteration_bounds = array<i64: 1, 2>, scalar_prefetch = 0 : i64, scratch_operands = 0 : i64, tpu.core_type = #tpu.core_type<tc>, window_params = [{transform_indices = @transform_0, window_bounds = array<i64: 1, 2, 1>}, {transform_indices = @transform_1, window_bounds = array<i64: 4, 2, 1>}, {transform_indices = @transform_2, window_bounds = array<i64: 1, 4, 2, 256>}, {transform_indices = @transform_3, window_bounds = array<i64: 1, 4, 2, 256>}]} {
    %c0 = arith.constant 0 : index
    %c0_0 = arith.constant 0 : index
    %c0_1 = arith.constant 0 : index
    %c0_2 = arith.constant 0 : index
    %0 = vector.load %arg4[%c0, %c0_0, %c0_1, %c0_2] : memref<1x4x2x256xf32, #tpu.memory_space<vmem>>, vector<1x4x2x256xf32>
    %1 = vector.shape_cast %0 : vector<1x4x2x256xf32> to vector<4x2x256xf32>
    %cst = arith.constant dense<0.000000e+00> : vector<4x2xf32>
    %2 = vector.multi_reduction <add>, %1, %cst [2] : vector<4x2x256xf32> to vector<4x2xf32>
    %3 = vector.shape_cast %2 : vector<4x2xf32> to vector<4x2x1xf32>
    %4 = arith.mulf %1, %1 : vector<4x2x256xf32>
    %cst_3 = arith.constant dense<0.000000e+00> : vector<4x2xf32>
    %5 = vector.multi_reduction <add>, %4, %cst_3 [2] : vector<4x2x256xf32> to vector<4x2xf32>
    %6 = vector.shape_cast %5 : vector<4x2xf32> to vector<4x2x1xf32>
    %cst_4 = arith.constant 3.906250e-03 : f32
    %7 = vector.broadcast %cst_4 : f32 to vector<4x2x1xf32>
    %8 = arith.mulf %3, %7 : vector<4x2x1xf32>
    %cst_5 = arith.constant 3.906250e-03 : f32
    %9 = vector.broadcast %cst_5 : f32 to vector<4x2x1xf32>
    %10 = arith.mulf %6, %9 : vector<4x2x1xf32>
    %11 = arith.mulf %8, %8 : vector<4x2x1xf32>
    %12 = arith.subf %10, %11 : vector<4x2x1xf32>
    %cst_6 = arith.constant dense<0.000000e+00> : vector<2x1xf32>
    %13 = vector.multi_reduction <add>, %12, %cst_6 [0] : vector<4x2x1xf32> to vector<2x1xf32>
    %14 = vector.shape_cast %13 : vector<2x1xf32> to vector<1x2x1xf32>
    %cst_7 = arith.constant 0.000000e+00 : f32
    %15 = vector.broadcast %cst_7 : f32 to vector<1x2x1xf32>
    %16 = arith.maximumf %14, %15 : vector<1x2x1xf32>
    %c0_8 = arith.constant 0 : index
    %c0_9 = arith.constant 0 : index
    %c0_10 = arith.constant 0 : index
    %17 = vector.load %arg2[%c0_8, %c0_9, %c0_10] : memref<1x2x1xf32, #tpu.memory_space<vmem>>, vector<1x2x1xf32>
    %cst_11 = arith.constant 9.99999974E-6 : f32
    %18 = vector.broadcast %cst_11 : f32 to vector<1x2x1xf32>
    %19 = arith.addf %16, %18 : vector<1x2x1xf32>
    %20 = math.rsqrt %19 : vector<1x2x1xf32>
    %21 = arith.mulf %17, %20 : vector<1x2x1xf32>
    %c0_12 = arith.constant 0 : index
    %c0_13 = arith.constant 0 : index
    %c0_14 = arith.constant 0 : index
    %22 = vector.load %arg3[%c0_12, %c0_13, %c0_14] : memref<4x2x1xf32, #tpu.memory_space<vmem>>, vector<4x2x1xf32>
    %23 = vector.broadcast %21 : vector<1x2x1xf32> to vector<4x2x1xf32>
    %24 = arith.mulf %8, %23 : vector<4x2x1xf32>
    %25 = arith.subf %22, %24 : vector<4x2x1xf32>
    %c0_15 = arith.constant 0 : index
    %c0_16 = arith.constant 0 : index
    %c0_17 = arith.constant 0 : index
    %c0_18 = arith.constant 0 : index
    %26 = vector.load %arg4[%c0_15, %c0_16, %c0_17, %c0_18] : memref<1x4x2x256xf32, #tpu.memory_space<vmem>>, vector<1x4x2x256xf32>
    %27 = vector.shape_cast %26 : vector<1x4x2x256xf32> to vector<4x2x256xf32>
    %28 = vector.broadcast %21 : vector<1x2x1xf32> to vector<4x2x256xf32>
    %29 = arith.mulf %27, %28 : vector<4x2x256xf32>
    %30 = vector.broadcast %25 : vector<4x2x1xf32> to vector<4x2x256xf32>
    %31 = arith.addf %29, %30 : vector<4x2x256xf32>
    %c0_19 = arith.constant 0 : index
    %c0_20 = arith.constant 0 : index
    %c0_21 = arith.constant 0 : index
    %c0_22 = arith.constant 0 : index
    %32 = vector.load %arg5[%c0_19, %c0_20, %c0_21, %c0_22] : memref<1x4x2x256xf32, #tpu.memory_space<vmem>>, vector<1x4x2x256xf32>
    %33 = vector.shape_cast %32 : vector<1x4x2x256xf32> to vector<4x2x256xf32>
    %34 = vector.shape_cast %31 : vector<4x2x256xf32> to vector<1x4x2x256xf32>
    tpu.vector_store %arg5[%c0_19, %c0_20, %c0_21, %c0_22], %34 {strides = array<i32>} : memref<1x4x2x256xf32, #tpu.memory_space<vmem>>, vector<1x4x2x256xf32>,
    return
  }
  func.func @transform_0(%arg0: i32, %arg1: i32) -> (i32, i32, i32) {
    %c0_i32 = arith.constant 0 : i32
    %c0_i32_0 = arith.constant 0 : i32
    %c0_i32_1 = arith.constant 0 : i32
    return %c0_i32, %arg0, %c0_i32_0 : i32, i32, i32
  }
  func.func @transform_1(%arg0: i32, %arg1: i32) -> (i32, i32, i32) {
    %c0_i32 = arith.constant 0 : i32
    %c0_i32_0 = arith.constant 0 : i32
    %c0_i32_1 = arith.constant 0 : i32
    return %c0_i32, %arg0, %c0_i32_0 : i32, i32, i32
  }
  func.func @transform_2(%arg0: i32, %arg1: i32) -> (i32, i32, i32, i32) {
    %c0_i32 = arith.constant 0 : i32
    %c0_i32_0 = arith.constant 0 : i32
    %c0_i32_1 = arith.constant 0 : i32
    return %arg1, %c0_i32, %arg0, %c0_i32_0 : i32, i32, i32, i32
  }
  func.func @transform_3(%arg0: i32, %arg1: i32) -> (i32, i32, i32, i32) {
    %c0_i32 = arith.constant 0 : i32
    %c0_i32_0 = arith.constant 0 : i32
    %c0_i32_1 = arith.constant 0 : i32
    return %arg1, %c0_i32, %arg0, %c0_i32_0 : i32, i32, i32, i32
  }
}

</mosaic_0001>

<bundles_post_ra>
// kernel: tpu_custom_call.1
= control target key start
LH: loop header
LB: loop body
LE: loop exit
PB: predicated region body
PF: predicated region fallthrough
CT: control target
= control target key end

     0   :  { %8 = vsyncpa [#allocation3], 0  ;;  %s998_s0 = inlined_call_operand.vmem [shape: f32[1,2,1], index: 0, kind: input, shape index: {}]   ;;  %s999_s1 = inlined_call_operand.vmem [shape: f32[4,2,1], index: 1, kind: input, shape index: {}]   ;;  %s1000_s2 = inlined_call_operand.hbm [shape: f32[2,4,2,256], index: 2, kind: input, shape index: {}]   ;;  %s1001_s3 = inlined_call_operand.hbm [shape: f32[2,4,2,256], index: 3, kind: output, shape index: {}]  }
   0x1   :  { %10 = vsyncpa [#allocation3 + $0x1], 0 }
   0x2   :  { %11 = vsyncpa [#allocation4], 0 }
   0x3   :  { %13 = vsyncpa [#allocation4 + $0x1], 0  ;;  %s815_s12 = smov 0   ;;  %s817_s13 = smov 0  }
   0x4   :  { %s819_s14 = smov 0   ;;  %s821_s15 = smov 0  }
   0x5   :  { %s823_s16 = smov 0   ;;  %s825_s17 = smov 0  }
   0x6 LB: > { %s583_s18 = sadd.s32 4294967295, %s787_s17   ;;  %s584_s19 = sadd.s32 4294967294, %s787_s17   ;;  %s787_s17 = sphi %s825_s17, %s19_s17   ;;  %s783_s16 = sphi %s823_s16, %s1010_s16   ;;  %s779_s15 = sphi %s821_s15, %s1009_s15   ;;  %s775_s14 = sphi %s819_s14, %s1008_s14   ;;  %s771_s13 = sphi %s817_s13, %s1007_s13   ;;  %s767_s12 = sphi %s815_s12, %s1006_s12  }
   0x7   : > { %s28_s20 = sadd.s32 1, %s783_s16  ;;  %s92_s21 = sadd.s32 1, %s775_s14 }
   0x8   : > { %p29_p0 = scmp.ge.s32.totalorder %s28_s20, 2  ;;  %p99_p1 = scmp.ne.s32.totalorder %s775_s14, %s771_s13 }
   0x9   : > { %p100_p2 = scmp.eq.s32.totalorder %s787_s17, 0  ;;  %p105_p3 = scmp.ne.s32.totalorder %s771_s13, %s767_s12 }
   0xa   : > { %s1012_s20 = smov (%p29_p0, %s28_s20), 0  ;;  %p106_p5 = scmp.eq.s32.totalorder %s583_s18, 0 }
   0xb   : > { %p856_p4 = por %p100_p2, %p99_p1  ;;  %s87_s23 = ssub.s32 %s783_s16, %s1012_s20 }
   0xc   : > { %p131_p6 = scmp.eq.s32.totalorder %s583_s18, 1  ;;  %p90_p7 = scmp.eq.s32.totalorder %s87_s23, 0 }
   0xd   : > { %p862_p8 = por %p106_p5, %p105_p3  ;;  %p137_p10 = scmp.eq.s32.totalorder %s584_s19, 1 }
   0xe   : > { %p866_p9 = por %p131_p6, %p99_p1  ;;  %p588_p12 = scmp.ge.s32.totalorder %s787_s17, 2 }
   0xf   : > { %s871_s26 = scalar_select %p90_p7, %s775_s14, %s92_s21  }
  0x10   : > { %p873_p11 = por %p137_p10, %p105_p3  ;;  %p614_p13 = scmp.lt.s32.totalorder %s787_s17, 2 }
  0x11   : > { %s171_s28 = sand.u32 1, %s775_s14   ;;  %s600_s30 = sshll.u32 %s783_s16, 4 }
  0x12   : > { %s589_s29 = sshll.u32 %s171_s28, 4  ;;  %s182_s6 = scalar_lea.hbm %s1000_s2, %s600_s30 }
  0x13   : > { %s175_s7 = scalar_lea.vmem [#allocation2], %s589_s29  ;;  %s183_s9 = sshll.u32 %s182_s6, 4  ;;  %s184_s9 = int_to_ptr.hbm [resolvable:$true] %s183_s9 }
  0x14   : > { %s185_s8 = sshll.u32 %s175_s7, 4  ;;  %p607_p0 = pnand %p614_p13, %p856_p4  ;;  %s186_s8 = int_to_ptr.vmem [resolvable:$true] %s185_s8 }
  0x15   : > { %p592_p1 = scmp.ge.s32.totalorder %s787_s17, 1  ;;  %s172_s10 = scalar_lea.sflag [#allocation3], %s171_s28 }
  0x16   : > { %s789_s11 = smov 64   ;;  %s790_s18 = smov 4  }
  0x17   : > { %609 = dma.hbm_to_vmem [thread:$0]  (!%p607_p0), %s184_s9, 256, %s186_s8, %s172_s10, %s789_s11, %s789_s11, %s790_s18  }
  0x18   : > { %p193_p2 = scmp.lt.s32.totalorder %s787_s17, 3 }
  0x1a   : > { %p194_p3 = pnand %p592_p1, %p193_p2 }
  0x1b   : > { %s889_s19 = sand.u32 (!%p194_p3), 1, %s771_s13  }
  0x1c   : > { %197 = sbr.rel (%p194_p3) target bundleno = 349 (0x15d), region = 32  ;;  %s593_s21 = sshll.u32 (!%p194_p3), %s889_s19, 4 }
  0x1d   : > { %s200_s23 = scalar_lea.sflag (!%p194_p3), [#allocation3], %s889_s19  ;;  %s203_s22 = scalar_lea.vmem (!%p194_p3), [#allocation2], %s593_s21 }
  0x21   : > { %758 = dma.done.wait (%p862_p8), %s200_s23, 256  }
  0x22   : > { %760 = vsyncadd (%p862_p8), %s200_s23, 4294967040  ;;  %v899_v0 = vld [vmem:[%s203_s22] sm:$0xf]  ;;  %v901_v1 = vld [vmem:[%s203_s22 + $0x4] sm:$0xf]  ;;  %vm272_vm0 = vcmask 1041408  }
  0x23   : > { %251 = vst [vmem:[#allocation1] ss:$4 sm:$0xff] %v899_v0  ;;  %v905_v2 = vld [vmem:[%s203_s22 + $0x8] sm:$0xf]  ;;  %v907_v3 = vld [vmem:[%s203_s22 + $0xc] sm:$0xf]  ;;  %v293_v11 = vmul.f32 %v899_v0, %v899_v0  ;;  %v294_v14 = vmul.f32 %v901_v1, %v901_v1 }
  0x24   : > { %255 = vst [vmem:[#allocation1 + $0x20] ss:$4 sm:$0xff] %v901_v1  ;;  %v295_v23 = vmul.f32 %v905_v2, %v905_v2  ;;  %v296_v24 = vmul.f32 %v907_v3, %v907_v3  ;;  %v791_v63 = vmov 0   ;;  %s234_s10 = scalar_lea.vmem [#allocation5], %s593_s21  ;;  %s601_s11 = sshll.u32 %s779_s15, 4 }
  0x25   : > { %670 = vset.pattern.permute.xlu2 %v791_v63  ;;  %672 = vset.pattern.permute.xlu1 %v791_v63  ;;  %s462_s22 = scalar_lea.hbm %s1001_s3, %s601_s11  ;;  %s463_s24 = sshll.u32 %s234_s10, 4  ;;  %s464_s24 = int_to_ptr.vmem [resolvable:$true] %s463_s24 }
  0x26   : > { %671 = vset.pattern.permute.xlu0 %v791_v63  ;;  %s465_s28 = sshll.u32 %s462_s22, 4  ;;  %s449_s15 = scalar_lea.sflag [#allocation4], %s889_s19  ;;  %s466_s28 = int_to_ptr.hbm [resolvable:$true] %s465_s28 }
  0x27   : > { %s719_s21 = sshra.s32 %s466_s28, 4  ;;  %s725_s5 = scalar_lea.hbm %s1001_s3, 32  ;;  %s720_s21 = int_to_ptr.hbm [resolvable:$true] %s719_s21 }
  0x28   : > { %s721_s29 = scalar_lea.hbm %s720_s21, 16  ;;  %p726_p7 = scmp.lt.s32.totalorder %s720_s21, %s1001_s3 }
  0x29   : > { %p722_p4 = scmp.ne.s32.totalorder %s720_s21, %s721_s29  ;;  %p727_p8 = scmp.lt.s32.totalorder %s725_s5, %s721_s29 }
  0x2a   : > { %v252_v4 = vld.sshfl [vmem:[#allocation1] sm:$0xff pattern:$0x73625140]  ;;  %v253_v5 = vld.sshfl [vmem:[#allocation1 + $0x8] sm:$0xff pattern:$0x73625140] }
  0x2b   : > { %v273_v6 = vsel %vm272_vm0, %v252_v4, 0.0  ;;  %v274_v7 = vsel %vm272_vm0, %v253_v5, 0.0  ;;  %258 = vst [vmem:[#allocation1] ss:$4 sm:$0xff] %v905_v2  ;;  %p723_p5 = pnand %p722_p4, %p866_p9  ;;  %p728_p10 = por %p727_p8, %p726_p7 }
  0x2c   : > { %v275_v8 = vadd.f32 %v274_v7, %v273_v6  ;;  %v256_v9 = vld.sshfl [vmem:[#allocation1 + $0x20] sm:$0xff pattern:$0x73625140]  ;;  %v257_v10 = vld.sshfl [vmem:[#allocation1 + $0x28] sm:$0xff pattern:$0x73625140] }
  0x2d   : > { %261 = vst [vmem:[#allocation1 + $0x20] ss:$4 sm:$0xff] %v907_v3  ;;  %v278_v12 = vsel %vm272_vm0, %v256_v9, 0.0  ;;  %v279_v13 = vsel %vm272_vm0, %v257_v10, 0.0  ;;  %p724_p6 = pneg %p723_p5 }
  0x2e   : > { %276 = vadd.xlane.f32.xlu0 %v275_v8  ;;  %v280_v17 = vadd.f32 %v279_v13, %v278_v12 }
  0x2f   : > { %p729_p13 = pnand %p728_p10, %p724_p6 }
  0x32   : > { %v259_v15 = vld.sshfl [vmem:[#allocation1] sm:$0xff pattern:$0x73625140]  ;;  %v260_v16 = vld.sshfl [vmem:[#allocation1 + $0x8] sm:$0xff pattern:$0x73625140] }
  0x33   : > { %v283_v18 = vsel %vm272_vm0, %v259_v15, 0.0  ;;  %v284_v19 = vsel %vm272_vm0, %v260_v16, 0.0  ;;  %301 = vst [vmem:[#allocation1] ss:$4 sm:$0xff] %v293_v11 }
  0x34   : > { %v285_v20 = vadd.f32 %v284_v19, %v283_v18  ;;  %v262_v21 = vld.sshfl [vmem:[#allocation1 + $0x20] sm:$0xff pattern:$0x73625140]  ;;  %v263_v22 = vld.sshfl [vmem:[#allocation1 + $0x28] sm:$0xff pattern:$0x73625140] }
  0x35   : > { %305 = vst [vmem:[#allocation1 + $0x20] ss:$4 sm:$0xff] %v294_v14  ;;  %v288_v35 = vsel %vm272_vm0, %v262_v21, 0.0  ;;  %v289_v36 = vsel %vm272_vm0, %v263_v22, 0.0 }
  0x36   : > { %286 = vadd.xlane.f32.xlu1 %v285_v20  ;;  %281 = vadd.xlane.f32.xlu0 %v280_v17  ;;  %v290_v41 = vadd.f32 %v289_v36, %v288_v35 }
  0x3a   : > { %v302_v25 = vld.sshfl [vmem:[#allocation1] sm:$0xff pattern:$0x73625140]  ;;  %v303_v26 = vld.sshfl [vmem:[#allocation1 + $0x8] sm:$0xff pattern:$0x73625140] }
  0x3b   : > { %308 = vst [vmem:[#allocation1] ss:$4 sm:$0xff] %v295_v23  ;;  %v322_v27 = vsel %vm272_vm0, %v302_v25, 0.0  ;;  %v323_v28 = vsel %vm272_vm0, %v303_v26, 0.0 }
  0x3c   : > { %v306_v29 = vld.sshfl [vmem:[#allocation1 + $0x20] sm:$0xff pattern:$0x73625140]  ;;  %v307_v30 = vld.sshfl [vmem:[#allocation1 + $0x28] sm:$0xff pattern:$0x73625140]  ;;  %v324_v31 = vadd.f32 %v323_v28, %v322_v27 }
  0x3d   : > { %v327_v32 = vsel %vm272_vm0, %v306_v29, 0.0  ;;  %v328_v33 = vsel %vm272_vm0, %v307_v30, 0.0  ;;  %311 = vst [vmem:[#allocation1 + $0x20] ss:$4 sm:$0xff] %v296_v24  ;;  %v366_v28 = vld [vmem:[%s998_s0] sm:$0x3] }
  0x3e   : > { %v329_v34 = vadd.f32 %v328_v33, %v327_v32  ;;  %325 = vadd.xlane.f32.xlu1 %v324_v31  ;;  %v380_v31 = vld [vmem:[%s999_s1 + $0x2] sm:$0x3]  ;;  %v379_v32 = vld [vmem:[%s999_s1] sm:$0x3] }
  0x40   : > { %330 = vadd.xlane.f32.xlu2 %v329_v34 }
  0x42   : > { %v309_v37 = vld.sshfl [vmem:[#allocation1] sm:$0xff pattern:$0x73625140]  ;;  %v310_v38 = vld.sshfl [vmem:[#allocation1 + $0x8] sm:$0xff pattern:$0x73625140] }
  0x43   : > { %v332_v39 = vsel %vm272_vm0, %v309_v37, 0.0  ;;  %v333_v40 = vsel %vm272_vm0, %v310_v38, 0.0  ;;  %v381_v38 = vld [vmem:[%s999_s1 + $0x4] sm:$0x3] }
  0x44   : > { %v334_v42 = vadd.f32 %v333_v40, %v332_v39  ;;  %v312_v43 = vld.sshfl [vmem:[#allocation1 + $0x20] sm:$0xff pattern:$0x73625140]  ;;  %v313_v44 = vld.sshfl [vmem:[#allocation1 + $0x28] sm:$0xff pattern:$0x73625140] }
  0x45   : > { %v337_v45 = vsel %vm272_vm0, %v312_v43, 0.0  ;;  %v338_v46 = vsel %vm272_vm0, %v313_v44, 0.0  ;;  %v792_v43 = vmov 269488144  }
  0x46   : > { %335 = vadd.xlane.f32.xlu0 %v334_v42  ;;  %v339_v47 = vadd.f32 %v338_v46, %v337_v45  ;;  %v396_v44 = vunpack.c.l.s4 %v792_v43 }
  0x48   : > { %291 = vadd.xlane.f32.xlu2 %v290_v41  ;;  %340 = vadd.xlane.f32.xlu1 %v339_v47  ;;  %v382_v41 = vld [vmem:[%s999_s1 + $0x6] sm:$0x3]  ;;  %v397_v46 = vunpack.c.0.s8 %v396_v44 }
  0xa1   : > { %v277_v48 = vpop.xlane.xlu0 %276 }
  0xa2   : > { %v342_v52 = vmul.f32 0.00390625, %v277_v48 }
  0xa4   : > { %v350_v57 = vmul.f32 %v342_v52, %v342_v52 }
  0xa9   : > { %v287_v49 = vpop.xlane.xlu1 %286  ;;  %v282_v50 = vpop.xlane.xlu0 %281 }
  0xaa   : > { %v343_v51 = vmul.f32 0.00390625, %v282_v50  ;;  %v344_v59 = vmul.f32 0.00390625, %v287_v49 }
  0xac   : > { %v351_v54 = vmul.f32 %v343_v51, %v343_v51  ;;  %v352_v4 = vmul.f32 %v344_v59, %v344_v59 }
  0xb1   : > { %v326_v53 = vpop.xlane.xlu1 %325 }
  0xb2   : > { %v346_v55 = vmul.f32 0.00390625, %v326_v53 }
  0xb3   : > { %v331_v56 = vpop.xlane.xlu2 %330 }
  0xb4   : > { %v347_v58 = vmul.f32 0.00390625, %v331_v56  ;;  %v354_v61 = vsub.f32 %v346_v55, %v350_v57 }
  0xb6   : > { %v355_v60 = vsub.f32 %v347_v58, %v351_v54  ;;  %v358_v6 = vsel %vm272_vm0, %v354_v61, 0.0 }
  0xb8   : > { %v359_v5 = vsel %vm272_vm0, %v355_v60, 0.0 }
  0xb9   : > { %v336_v62 = vpop.xlane.xlu0 %335  ;;  %v360_v13 = vadd.f32 %v359_v5, %v358_v6 }
  0xba   : > { %v348_v7 = vmul.f32 0.00390625, %v336_v62 }
  0xbb   : > { %v292_v8 = vpop.xlane.xlu2 %291  ;;  %v341_v9 = vpop.xlane.xlu1 %340 }
  0xbc   : > { %v345_v10 = vmul.f32 0.00390625, %v292_v8  ;;  %v356_v11 = vsub.f32 %v348_v7, %v352_v4  ;;  %v349_v12 = vmul.f32 0.00390625, %v341_v9 }
  0xbe   : > { %v353_v14 = vmul.f32 %v345_v10, %v345_v10  ;;  %v361_v15 = vsel %vm272_vm0, %v356_v11, 0.0 }
  0xbf   : > { %v362_v16 = vadd.f32 %v361_v15, %v360_v13 }
  0xc0   : > { %v357_v17 = vsub.f32 %v349_v12, %v353_v14 }
  0xc2   : > { %v363_v18 = vsel %vm272_vm0, %v357_v17, 0.0 }
  0xc3   : > { %v364_v19 = vadd.f32 %v363_v18, %v362_v16 }
  0xc5   : > { %v365_v20 = vmax.f32 %v364_v19, 0.0 }
  0xc7   : > { %v367_v21 = vadd.f32 1e-05, %v365_v20 }
  0xc9   : > { %673 = vrsqrt.f32 %v367_v21  ;;  %vm374_vm2 = vweird.f32 %v367_v21 }
  0xcf   : > { %v674_v22 = vpop.eup %673 }
  0xd0   : > { %v369_v23 = vmul.f32 %v674_v22, %v367_v21  ;;  %vm375_vm1 = vweird.f32 %v674_v22 }
  0xd1   : > { %vm376_vm3 = vmor %vm374_vm2, %vm375_vm1 }
  0xd2   : > { %v370_v24 = vmul.f32 %v674_v22, %v369_v23 }
  0xd4   : > { %v371_v25 = vmul.f32 0.5, %v370_v24 }
  0xd6   : > { %v372_v26 = vsub.f32 1.5, %v371_v25 }
  0xd8   : > { %v373_v27 = vmul.f32 %v674_v22, %v372_v26 }
  0xda   : > { %v377_v29 = vsel %vm376_vm3, %v674_v22, %v373_v27 }
  0xdb   : > { %v378_v30 = vmul.f32 %v377_v29, %v366_v28 }
  0xdd   : > { %393 = vperm.xlu2 %670, %v378_v30   ;;  %v384_v33 = vmul.f32 %v378_v30, %v343_v51  ;;  %v383_v34 = vmul.f32 %v378_v30, %v342_v52  ;;  %v385_v37 = vmul.f32 %v378_v30, %v344_v59  ;;  %v386_v40 = vmul.f32 %v378_v30, %v345_v10 }
  0xdf   : > { %v388_v35 = vsub.f32 %v380_v31, %v384_v33  ;;  %v387_v36 = vsub.f32 %v379_v32, %v383_v34  ;;  %v389_v39 = vsub.f32 %v381_v38, %v385_v37  ;;  %v390_v42 = vsub.f32 %v382_v41, %v386_v40 }
  0xe1   : > { %410 = vperm.xlu1 %672, %v388_v35   ;;  %406 = vperm.xlu0 %671, %v387_v36  }
  0xe5   : > { %414 = vperm.xlu2 %670, %v389_v39  }
  0xed   : > { %418 = vperm.xlu2 %670, %v390_v42  }
 0x137   : > { %v394_v45 = vpop.permute.xlu2 %393 }
 0x138   : > { %v398_v47 = vperm.slane %v394_v45, %v397_v46 }
 0x13a   : > { %v402_v49 = vmul.f32 %v398_v47, %v905_v2  ;;  %v403_v53 = vmul.f32 %v398_v47, %v907_v3  ;;  %v401_v57 = vmul.f32 %v398_v47, %v901_v1  ;;  %v400_v59 = vmul.f32 %v398_v47, %v899_v0 }
 0x13f   : > { %v415_v48 = vpop.permute.xlu2 %414 }
 0x140   : > { %v431_v50 = vperm.slane %v415_v48, %v397_v46 }
 0x142   : > { %v442_v51 = vadd.f32 %v431_v50, %v402_v49 }
 0x144   : > { %446 = vst [vmem:[%s234_s10 + $0x8] sm:$0xf] %v442_v51 }
 0x147   : > { %v419_v52 = vpop.permute.xlu2 %418 }
 0x148   : > { %v435_v54 = vperm.slane %v419_v52, %v397_v46 }
 0x14a   : > { %v443_v55 = vadd.f32 %v435_v54, %v403_v53 }
 0x14c   : > { %447 = vst [vmem:[%s234_s10 + $0xc] sm:$0xf] %v443_v55 }
 0x153   : > { %v411_v56 = vpop.permute.xlu1 %410  ;;  %v407_v2 = vpop.permute.xlu0 %406 }
 0x154   : > { %v427_v58 = vperm.slane %v411_v56, %v397_v46  ;;  %v423_v3 = vperm.slane %v407_v2, %v397_v46 }
 0x156   : > { %v441_v60 = vadd.f32 %v427_v58, %v401_v57  ;;  %v440_v61 = vadd.f32 %v423_v3, %v400_v59 }
 0x158   : > { %445 = vst [vmem:[%s234_s10 + $0x4] sm:$0xf] %v441_v60 }
 0x159   : > { %444 = vst [vmem:[%s234_s10] sm:$0xf] %v440_v61 }
 0x15a   : > { %732 = shalt.err (!%p729_p13)
}
 0x15b   : > { %s793_s19 = smov 64   ;;  %s794_s8 = smov 4  }
 0x15c   : > { %604 = dma.vmem_to_hbm [thread:$0]  (%p866_p9), %s464_s24, 256, %s466_s28, %s449_s15, %s793_s19, %s793_s19, %s794_s8  }
 0x15d PF: > { %s480_s9 = sand.u32 1, %s767_s12   ;;  %p611_p0 = pnand %p588_p12, %p873_p11 }
 0x15e   : > { %s481_s10 = scalar_lea.sflag [#allocation4], %s480_s9 }
 0x15f   : > { %p612_p1 = pneg %p611_p0 }
 0x161   : > { %762 = dma.done.wait (%p612_p1), %s481_s10, 256  }
 0x162   : > { %764 = vsyncadd (%p612_p1), %s481_s10, 4294967040  ;;  %s19_s17 = sadd.s32 1, %s787_s17   ;;  %s1006_s12 = smov %s771_s13 }
 0x163   : > { %p16_p2 = scmp.ge.s32.totalorder %s19_s17, 4   ;;  %s1007_s13 = smov %s775_s14 }
 0x164   : > { %s1008_s14 = smov %s871_s26  ;;  %s1009_s15 = smov %s783_s16 }
 0x165   : > { %s1010_s16 = smov %s1012_s20  ;;  %18 = sbr.rel (!%p16_p2) target bundleno = 6 (0x6), region = 85 }
 0x16a   :  { %487 = vsyncpa [#allocation3], 1 }
 0x16b   :  { %489 = vsyncpa [#allocation3 + $0x1], 1 }
 0x16c   :  { %490 = vsyncpa [#allocation4], 1 }
 0x16d   :  { %492 = vsyncpa [#allocation4 + $0x1], 1 }

</bundles_post_ra>
